<compile_context>
chip_gen: v7x
topology: tpu7x:2x2x1
jax: 0.10.0
libtpu: 0.0.40
codegen_flags: <defaults>
</compile_context>

<pallas_src>
import jax
import jax.numpy as jnp
from jax.experimental import pallas as pl
from jax.experimental.pallas import tpu as pltpu


def critic_kernel(s_ref, a_ref,
                  w1s_ref, w1a_ref, w2_ref, w3_ref, w4_ref, w5_ref,
                  small_ref,
                  o_ref):
    # Packed small operands: one DMA, static slices in-kernel.
    small = small_ref[...]                       # (7, 256) f32
    b1    = small[0:1, :]                        # (1, 256)
    gamma = small[1:2, :]                        # (1, 256)
    beta  = small[2:3, :]                        # (1, 256)
    b2    = small[3:4, 0:128]                    # (1, 128)
    b3    = small[4:5, 0:64]                     # (1, 64)
    b4    = small[5:6, 0:32]                     # (1, 32)
    b5    = small[6:7, 0:1]                      # (1, 1)

    # fc1 with fused concat: x = [states | actions]  =>  s @ W1s + a @ W1a
    s_bf = s_ref[...].astype(jnp.bfloat16)       # (B, state_dim)
    a_bf = a_ref[...].astype(jnp.bfloat16)       # (B, action_dim)
    h1 = (jnp.dot(s_bf, w1s_ref[...], preferred_element_type=jnp.float32)
          + jnp.dot(a_bf, w1a_ref[...], preferred_element_type=jnp.float32)
          + b1)                                  # (B, 256) f32
    h1 = jnp.maximum(h1, 0.0)                    # ReLU (f32)

    # BatchNorm1d, training-mode batch stats, biased variance (one-pass).
    mean = jnp.mean(h1, axis=0, keepdims=True)                    # (1, 256)
    var = jnp.mean(h1 * h1, axis=0, keepdims=True) - mean * mean
    var = jnp.maximum(var, 0.0)
    h1 = (h1 - mean) * jax.lax.rsqrt(var + 1e-5)
    h1 = h1 * gamma + beta

    # fc2 + ReLU
    h2 = jnp.dot(h1.astype(jnp.bfloat16), w2_ref[...],
                 preferred_element_type=jnp.float32) + b2
    h2 = jnp.maximum(h2, 0.0)                    # (B, 128)

    # fc3 + ReLU
    h3 = jnp.dot(h2.astype(jnp.bfloat16), w3_ref[...],
                 preferred_element_type=jnp.float32) + b3
    h3 = jnp.maximum(h3, 0.0)                    # (B, 64)

    # fc4 + ReLU
    h4 = jnp.dot(h3.astype(jnp.bfloat16), w4_ref[...],
                 preferred_element_type=jnp.float32) + b4
    h4 = jnp.maximum(h4, 0.0)                    # (B, 32)

    # fc5 (no activation); f32 accumulate for the precision-sensitive Q head.
    out = jnp.dot(h4.astype(jnp.bfloat16), w5_ref[...],
                  preferred_element_type=jnp.float32) + b5
    o_ref[...] = out.astype(o_ref.dtype)         # (B, 1)


def critic_forward(states, actions, params):
    """Whole forward in one pallas_call; no XLA concat / no extra HLO ops."""
    B = states.shape[0]
    operands = (
        states, actions,
        params["w1s"], params["w1a"],
        params["w2"], params["w3"], params["w4"], params["w5"],
        params["small"],
    )
    vmem = pl.BlockSpec(memory_space=pltpu.MemorySpace.VMEM)
    return pl.pallas_call(
        critic_kernel,
        out_shape=jax.ShapeDtypeStruct((B, 1), jnp.float32),
        in_specs=[vmem] * len(operands),
        out_specs=vmem,
    )(*operands)


def init_params(key, state_dim, action_dim):
    """Deterministic init mirroring the PyTorch module's reset_parameters().

    hidden_init() in the reference uses weight.size()[0] == out_features, so
    lim = 1/sqrt(out_features) for fc1..fc4 (quirk reproduced here).  Biases
    keep the default nn.Linear init: U(-1/sqrt(in_features), 1/sqrt(in_features)).
    Weights are stored as (in, out) in bf16 (MXU operands); biases / BN affine
    params are packed into one (7, 256) f32 array.
    """
    input_size = state_dim + action_dim
    dims = [input_size, 256, 128, 64, 32, 1]
    keys = jax.random.split(key, 10)
    ki = 0
    weights_f32 = {}
    biases = {}
    for layer in range(1, 6):
        fan_in, fan_out = dims[layer - 1], dims[layer]
        if layer < 5:
            w_lim = 1.0 / float(fan_out) ** 0.5     # hidden_init quirk
        else:
            w_lim = 0.003
        b_lim = 1.0 / float(fan_in) ** 0.5
        weights_f32[layer] = jax.random.uniform(
            keys[ki], (fan_in, fan_out), jnp.float32, minval=-w_lim, maxval=w_lim)
        ki += 1
        biases[layer] = jax.random.uniform(
            keys[ki], (fan_out,), jnp.float32, minval=-b_lim, maxval=b_lim)
        ki += 1

    def pad256(v):
        return jnp.pad(v, (0, 256 - v.shape[0]))

    params = {
        # fc1 weight split at the state/action boundary -> fused concat.
        "w1s": weights_f32[1][:state_dim].astype(jnp.bfloat16),
        "w1a": weights_f32[1][state_dim:].astype(jnp.bfloat16),
        "w2": weights_f32[2].astype(jnp.bfloat16),
        "w3": weights_f32[3].astype(jnp.bfloat16),
        "w4": weights_f32[4].astype(jnp.bfloat16),
        "w5": weights_f32[5].astype(jnp.bfloat16),
        # rows: b1, bn_gamma, bn_beta, b2, b3, b4, b5 (zero-padded to 256).
        "small": jnp.stack(
            [biases[1],
             jnp.ones((256,), jnp.float32),      # bn gamma
             jnp.zeros((256,), jnp.float32),     # bn beta
             pad256(biases[2]), pad256(biases[3]),
             pad256(biases[4]), pad256(biases[5])],
            axis=0),
    }
    return params


if __name__ == "__main__":
    key = jax.random.PRNGKey(0)
    k_s, k_a, k_p = jax.random.split(key, 3)

    B = 8
    state_dim = 20
    action_dim = 12

    states = jax.random.normal(k_s, (B, state_dim), jnp.float32)
    actions = jax.random.normal(k_a, (B, action_dim), jnp.float32)
    params = init_params(k_p, state_dim, action_dim)

    out = critic_forward(states, actions, params)
    out = jax.block_until_ready(out)
    assert out.shape == (B, 1), out.shape
    assert bool(jnp.all(jnp.isfinite(out)))
    print("KERNEL_OK")
</pallas_src>

<mosaic_0001>
module attributes {stable_mosaic.version = 11 : i64} {
  func.func @critic_kernel(%arg0: memref<8x20xf32, #tpu.memory_space<vmem>>, %arg1: memref<8x12xf32, #tpu.memory_space<vmem>>, %arg2: memref<20x256xbf16, #tpu.memory_space<vmem>>, %arg3: memref<12x256xbf16, #tpu.memory_space<vmem>>, %arg4: memref<256x128xbf16, #tpu.memory_space<vmem>>, %arg5: memref<128x64xbf16, #tpu.memory_space<vmem>>, %arg6: memref<64x32xbf16, #tpu.memory_space<vmem>>, %arg7: memref<32x1xbf16, #tpu.memory_space<vmem>>, %arg8: memref<7x256xf32, #tpu.memory_space<vmem>>, %arg9: memref<8x1xf32, #tpu.memory_space<vmem>>) attributes {dimension_semantics = [], scalar_prefetch = 0 : i64, scratch_operands = 0 : i64, tpu.core_type = #tpu.core_type<tc>} {
    %c0 = arith.constant 0 : index
    %c0_0 = arith.constant 0 : index
    %0 = vector.load %arg8[%c0, %c0_0] : memref<7x256xf32, #tpu.memory_space<vmem>>, vector<7x256xf32>
    %1 = vector.extract_strided_slice %0 {offsets = [0, 0], sizes = [1, 256], strides = [1, 1]} : vector<7x256xf32> to vector<1x256xf32>
    %2 = vector.extract_strided_slice %0 {offsets = [1, 0], sizes = [1, 256], strides = [1, 1]} : vector<7x256xf32> to vector<1x256xf32>
    %3 = vector.extract_strided_slice %0 {offsets = [2, 0], sizes = [1, 256], strides = [1, 1]} : vector<7x256xf32> to vector<1x256xf32>
    %4 = vector.extract_strided_slice %0 {offsets = [3, 0], sizes = [1, 128], strides = [1, 1]} : vector<7x256xf32> to vector<1x128xf32>
    %5 = vector.extract_strided_slice %0 {offsets = [4, 0], sizes = [1, 64], strides = [1, 1]} : vector<7x256xf32> to vector<1x64xf32>
    %6 = vector.extract_strided_slice %0 {offsets = [5, 0], sizes = [1, 32], strides = [1, 1]} : vector<7x256xf32> to vector<1x32xf32>
    %7 = vector.extract_strided_slice %0 {offsets = [6, 0], sizes = [1, 1], strides = [1, 1]} : vector<7x256xf32> to vector<1x1xf32>
    %c0_1 = arith.constant 0 : index
    %c0_2 = arith.constant 0 : index
    %8 = vector.load %arg0[%c0_1, %c0_2] : memref<8x20xf32, #tpu.memory_space<vmem>>, vector<8x20xf32>
    %9 = arith.truncf %8 : vector<8x20xf32> to vector<8x20xbf16>
    %c0_3 = arith.constant 0 : index
    %c0_4 = arith.constant 0 : index
    %10 = vector.load %arg1[%c0_3, %c0_4] : memref<8x12xf32, #tpu.memory_space<vmem>>, vector<8x12xf32>
    %11 = arith.truncf %10 : vector<8x12xf32> to vector<8x12xbf16>
    %c0_5 = arith.constant 0 : index
    %c0_6 = arith.constant 0 : index
    %12 = vector.load %arg2[%c0_5, %c0_6] : memref<20x256xbf16, #tpu.memory_space<vmem>>, vector<20x256xbf16>
    %cst = arith.constant dense<0.000000e+00> : vector<8x256xf32>
    %13 = tpu.matmul %9, %12, %cst {dimension_numbers = #tpu.dot_dimension_numbers<[1], [0], [0], [1], [0, 0, 1, 1], [], []>} : vector<8x20xbf16>, vector<20x256xbf16>, vector<8x256xf32> -> vector<8x256xf32>
    %c0_7 = arith.constant 0 : index
    %c0_8 = arith.constant 0 : index
    %14 = vector.load %arg3[%c0_7, %c0_8] : memref<12x256xbf16, #tpu.memory_space<vmem>>, vector<12x256xbf16>
    %cst_9 = arith.constant dense<0.000000e+00> : vector<8x256xf32>
    %15 = tpu.matmul %11, %14, %cst_9 {dimension_numbers = #tpu.dot_dimension_numbers<[1], [0], [0], [1], [0, 0, 1, 1], [], []>} : vector<8x12xbf16>, vector<12x256xbf16>, vector<8x256xf32> -> vector<8x256xf32>
    %16 = arith.addf %13, %15 : vector<8x256xf32>
    %17 = vector.broadcast %1 : vector<1x256xf32> to vector<8x256xf32>
    %18 = arith.addf %16, %17 : vector<8x256xf32>
    %cst_10 = arith.constant 0.000000e+00 : f32
    %19 = vector.broadcast %cst_10 : f32 to vector<8x256xf32>
    %20 = arith.maximumf %18, %19 : vector<8x256xf32>
    %cst_11 = arith.constant dense<0.000000e+00> : vector<256xf32>
    %21 = vector.multi_reduction <add>, %20, %cst_11 [0] : vector<8x256xf32> to vector<256xf32>
    %22 = vector.shape_cast %21 : vector<256xf32> to vector<1x256xf32>
    %cst_12 = arith.constant 8.000000e+00 : f32
    %23 = vector.broadcast %cst_12 : f32 to vector<1x256xf32>
    %24 = arith.divf %22, %23 : vector<1x256xf32>
    %25 = arith.mulf %20, %20 : vector<8x256xf32>
    %cst_13 = arith.constant dense<0.000000e+00> : vector<256xf32>
    %26 = vector.multi_reduction <add>, %25, %cst_13 [0] : vector<8x256xf32> to vector<256xf32>
    %27 = vector.shape_cast %26 : vector<256xf32> to vector<1x256xf32>
    %cst_14 = arith.constant 8.000000e+00 : f32
    %28 = vector.broadcast %cst_14 : f32 to vector<1x256xf32>
    %29 = arith.divf %27, %28 : vector<1x256xf32>
    %30 = arith.mulf %24, %24 : vector<1x256xf32>
    %31 = arith.subf %29, %30 : vector<1x256xf32>
    %cst_15 = arith.constant 0.000000e+00 : f32
    %32 = vector.broadcast %cst_15 : f32 to vector<1x256xf32>
    %33 = arith.maximumf %31, %32 : vector<1x256xf32>
    %34 = vector.broadcast %24 : vector<1x256xf32> to vector<8x256xf32>
    %35 = arith.subf %20, %34 : vector<8x256xf32>
    %cst_16 = arith.constant 9.99999974E-6 : f32
    %36 = vector.broadcast %cst_16 : f32 to vector<1x256xf32>
    %37 = arith.addf %33, %36 : vector<1x256xf32>
    %38 = math.rsqrt %37 : vector<1x256xf32>
    %39 = vector.broadcast %38 : vector<1x256xf32> to vector<8x256xf32>
    %40 = arith.mulf %35, %39 : vector<8x256xf32>
    %41 = vector.broadcast %2 : vector<1x256xf32> to vector<8x256xf32>
    %42 = arith.mulf %40, %41 : vector<8x256xf32>
    %43 = vector.broadcast %3 : vector<1x256xf32> to vector<8x256xf32>
    %44 = arith.addf %42, %43 : vector<8x256xf32>
    %45 = arith.truncf %44 : vector<8x256xf32> to vector<8x256xbf16>
    %c0_17 = arith.constant 0 : index
    %c0_18 = arith.constant 0 : index
    %46 = vector.load %arg4[%c0_17, %c0_18] : memref<256x128xbf16, #tpu.memory_space<vmem>>, vector<256x128xbf16>
    %cst_19 = arith.constant dense<0.000000e+00> : vector<8x128xf32>
    %47 = tpu.matmul %45, %46, %cst_19 {dimension_numbers = #tpu.dot_dimension_numbers<[1], [0], [0], [1], [0, 0, 1, 1], [], []>} : vector<8x256xbf16>, vector<256x128xbf16>, vector<8x128xf32> -> vector<8x128xf32>
    %48 = vector.broadcast %4 : vector<1x128xf32> to vector<8x128xf32>
    %49 = arith.addf %47, %48 : vector<8x128xf32>
    %cst_20 = arith.constant 0.000000e+00 : f32
    %50 = vector.broadcast %cst_20 : f32 to vector<8x128xf32>
    %51 = arith.maximumf %49, %50 : vector<8x128xf32>
    %52 = arith.truncf %51 : vector<8x128xf32> to vector<8x128xbf16>
    %c0_21 = arith.constant 0 : index
    %c0_22 = arith.constant 0 : index
    %53 = vector.load %arg5[%c0_21, %c0_22] : memref<128x64xbf16, #tpu.memory_space<vmem>>, vector<128x64xbf16>
    %cst_23 = arith.constant dense<0.000000e+00> : vector<8x64xf32>
    %54 = tpu.matmul %52, %53, %cst_23 {dimension_numbers = #tpu.dot_dimension_numbers<[1], [0], [0], [1], [0, 0, 1, 1], [], []>} : vector<8x128xbf16>, vector<128x64xbf16>, vector<8x64xf32> -> vector<8x64xf32>
    %55 = vector.broadcast %5 : vector<1x64xf32> to vector<8x64xf32>
    %56 = arith.addf %54, %55 : vector<8x64xf32>
    %cst_24 = arith.constant 0.000000e+00 : f32
    %57 = vector.broadcast %cst_24 : f32 to vector<8x64xf32>
    %58 = arith.maximumf %56, %57 : vector<8x64xf32>
    %59 = arith.truncf %58 : vector<8x64xf32> to vector<8x64xbf16>
    %c0_25 = arith.constant 0 : index
    %c0_26 = arith.constant 0 : index
    %60 = vector.load %arg6[%c0_25, %c0_26] : memref<64x32xbf16, #tpu.memory_space<vmem>>, vector<64x32xbf16>
    %cst_27 = arith.constant dense<0.000000e+00> : vector<8x32xf32>
    %61 = tpu.matmul %59, %60, %cst_27 {dimension_numbers = #tpu.dot_dimension_numbers<[1], [0], [0], [1], [0, 0, 1, 1], [], []>} : vector<8x64xbf16>, vector<64x32xbf16>, vector<8x32xf32> -> vector<8x32xf32>
    %62 = vector.broadcast %6 : vector<1x32xf32> to vector<8x32xf32>
    %63 = arith.addf %61, %62 : vector<8x32xf32>
    %cst_28 = arith.constant 0.000000e+00 : f32
    %64 = vector.broadcast %cst_28 : f32 to vector<8x32xf32>
    %65 = arith.maximumf %63, %64 : vector<8x32xf32>
    %66 = arith.truncf %65 : vector<8x32xf32> to vector<8x32xbf16>
    %c0_29 = arith.constant 0 : index
    %c0_30 = arith.constant 0 : index
    %67 = vector.load %arg7[%c0_29, %c0_30] : memref<32x1xbf16, #tpu.memory_space<vmem>>, vector<32x1xbf16>
    %cst_31 = arith.constant dense<0.000000e+00> : vector<8x1xf32>
    %68 = tpu.matmul %66, %67, %cst_31 {dimension_numbers = #tpu.dot_dimension_numbers<[1], [0], [0], [1], [0, 0, 1, 1], [], []>} : vector<8x32xbf16>, vector<32x1xbf16>, vector<8x1xf32> -> vector<8x1xf32>
    %69 = vector.broadcast %7 : vector<1x1xf32> to vector<8x1xf32>
    %70 = arith.addf %68, %69 : vector<8x1xf32>
    %c0_32 = arith.constant 0 : index
    %c0_33 = arith.constant 0 : index
    %71 = vector.load %arg9[%c0_32, %c0_33] : memref<8x1xf32, #tpu.memory_space<vmem>>, vector<8x1xf32>
    tpu.vector_store %arg9[%c0_32, %c0_33], %70 {strides = array<i32>} : memref<8x1xf32, #tpu.memory_space<vmem>>, vector<8x1xf32>,
    return
  }
}

</mosaic_0001>

<bundles_post_ra>
// kernel: tpu_custom_call.1
= control target key start
LH: loop header
LB: loop body
LE: loop exit
PB: predicated region body
PF: predicated region fallthrough
CT: control target
= control target key end

     0   :  { %14 = vsyncpa [#allocation3], 0  ;;  %s1302_s0 = inlined_call_operand.hbm [shape: f32[8,20], index: 0, kind: input, shape index: {}]   ;;  %s1303_s1 = inlined_call_operand.hbm [shape: f32[8,12], index: 1, kind: input, shape index: {}]   ;;  %s1304_s2 = inlined_call_operand.hbm [shape: bf16[20,256], index: 2, kind: input, shape index: {}]   ;;  %s1305_s3 = inlined_call_operand.hbm [shape: bf16[12,256], index: 3, kind: input, shape index: {}]   ;;  %s1306_s4 = inlined_call_operand.vmem [shape: bf16[256,128], index: 4, kind: input, shape index: {}]   ;;  %s1307_s5 = inlined_call_operand.vmem [shape: bf16[128,64], index: 5, kind: input, shape index: {}]   ;;  %s1308_s6 = inlined_call_operand.vmem [shape: bf16[64,32], index: 6, kind: input, shape index: {}]   ;;  %s1309_s7 = inlined_call_operand.vmem [shape: bf16[32,1], index: 7, kind: input, shape index: {}]   ;;  %s1310_s8 = inlined_call_operand.hbm [shape: f32[7,256], index: 8, kind: input, shape index: {}]   ;;  %s1311_s9 = inlined_call_operand.vmem [shape: f32[8,1], index: 9, kind: output, shape index: {}]  }
   0x1   :  { %15 = vsyncpa [#allocation5], 0 }
   0x2   :  { %16 = vsyncpa [#allocation8], 0  ;;  %s1040_s30 = smov [#allocation4]   ;;  %s924_s13 = scalar_lea.hbm %s1303_s1, 128 }
   0x3   :  { %s33_s10 = sshll.u32 %s1040_s30, 4  ;;  %p925_p0 = scmp.ne.s32.totalorder %s1303_s1, %s924_s13  ;;  %s34_s10 = int_to_ptr.vmem [resolvable:$true] %s33_s10 }
   0x4   :  { %p928_p1 = scmp.lt.u32.totalorder %s924_s13, %s1303_s1 }
   0x6   :  { %p930_p2 = pnand %p928_p1, %p925_p0 }
   0x8   :  { %933 = shalt.err (!%p930_p2)
}
   0x9   :  { %s934_s18 = scalar_lea.vmem %s34_s10, 128  ;;  %p939_p4 = scmp.lt.s32.totalorder %s34_s10, %s34_s10 }
   0xa   :  { %p935_p3 = scmp.ne.s32.totalorder %s34_s10, %s934_s18  ;;  %p940_p5 = scmp.lt.s32.totalorder %s934_s18, %s934_s18 }
   0xc   :  { %p941_p6 = por %p940_p5, %p939_p4 }
   0xe   :  { %p942_p7 = pnand %p941_p6, %p935_p3 }
  0x10   :  { %945 = shalt.err (!%p942_p7)
}
  0x11   :  { %36 = dma.hbm_to_vmem [thread:$0]  %s1303_s1, 128, %s34_s10, [#allocation5]  }
  0x12   :  { %s1041_s21 = smov [#allocation7]   ;;  %s1042_s23 = smov [#allocation2]  }
  0x13   :  { %s54_s22 = sshll.u32 %s1041_s21, 4  ;;  %s23_s24 = sshll.u32 %s1042_s23, 4  ;;  %s55_s22 = int_to_ptr.vmem [resolvable:$true] %s54_s22  ;;  %s24_s24 = int_to_ptr.vmem [resolvable:$true] %s23_s24 }
  0x14   :  { %s946_s27 = scalar_lea.hbm %s1305_s3, 256 }
  0x15   :  { %p947_p8 = scmp.ne.s32.totalorder %s1305_s3, %s946_s27  ;;  %p950_p9 = scmp.lt.u32.totalorder %s946_s27, %s1305_s3 }
  0x17   :  { %p952_p10 = pnand %p950_p9, %p947_p8 }
  0x19   :  { %955 = shalt.err (!%p952_p10)
}
  0x1a   :  { %s956_s1 = scalar_lea.vmem %s55_s22, 256  ;;  %p961_p12 = scmp.lt.s32.totalorder %s55_s22, %s55_s22 }
  0x1b   :  { %p957_p11 = scmp.ne.s32.totalorder %s55_s22, %s956_s1  ;;  %p962_p13 = scmp.lt.s32.totalorder %s956_s1, %s956_s1 }
  0x1d   :  { %p963_p0 = por %p962_p13, %p961_p12 }
  0x1f   :  { %p964_p1 = pnand %p963_p0, %p957_p11 }
  0x21   :  { %967 = shalt.err (!%p964_p1)
}
  0x22   :  { %s1043_s10 = smov 128   ;;  %s1044_s12 = smov 8  }
  0x23   :  { %60 = dma.hbm_to_vmem [thread:$0]  %s1305_s3, 256, %s55_s22, [#allocation8], %s1043_s10, %s1043_s10, %s1044_s12  }
  0x24   :  { %s968_s17 = scalar_lea.hbm %s1302_s0, 128 }
  0x25   :  { %p969_p2 = scmp.ne.s32.totalorder %s1302_s0, %s968_s17  ;;  %p972_p3 = scmp.lt.u32.totalorder %s968_s17, %s1302_s0 }
  0x27   :  { %p974_p4 = pnand %p972_p3, %p969_p2 }
  0x29   :  { %977 = shalt.err (!%p974_p4)
}
  0x2a   :  { %s978_s23 = scalar_lea.vmem %s24_s24, 128  ;;  %p983_p6 = scmp.lt.s32.totalorder %s24_s24, %s24_s24 }
  0x2b   :  { %p979_p5 = scmp.ne.s32.totalorder %s24_s24, %s978_s23  ;;  %p984_p7 = scmp.lt.s32.totalorder %s978_s23, %s978_s23 }
  0x2d   :  { %p985_p8 = por %p984_p7, %p983_p6 }
  0x2f   :  { %p986_p9 = pnand %p985_p8, %p979_p5 }
  0x31   :  { %989 = shalt.err (!%p986_p9)
}
  0x32   :  { %26 = dma.hbm_to_vmem [thread:$0]  %s1302_s0, 128, %s24_s24, [#allocation3]  }
  0x33   :  { %s1045_s25 = smov [#allocation6]   ;;  %s1046_s27 = smov [#allocation9]  }
  0x34   :  { %s42_s26 = sshll.u32 %s1045_s25, 4  ;;  %s75_s28 = sshll.u32 %s1046_s27, 4  ;;  %s43_s26 = int_to_ptr.vmem [resolvable:$true] %s42_s26  ;;  %s76_s28 = int_to_ptr.vmem [resolvable:$true] %s75_s28 }
  0x35   :  { %s990_s11 = scalar_lea.hbm %s1304_s2, 384 }
  0x36   :  { %p991_p10 = scmp.ne.s32.totalorder %s1304_s2, %s990_s11  ;;  %p994_p11 = scmp.lt.u32.totalorder %s990_s11, %s1304_s2 }
  0x38   :  { %p996_p12 = pnand %p994_p11, %p991_p10 }
  0x3a   :  { %999 = shalt.err (!%p996_p12)
}
  0x3b   :  { %s1000_s0 = scalar_lea.vmem %s43_s26, 384  ;;  %p1005_p0 = scmp.lt.s32.totalorder %s43_s26, %s43_s26 }
  0x3c   :  { %p1001_p13 = scmp.ne.s32.totalorder %s43_s26, %s1000_s0  ;;  %p1006_p1 = scmp.lt.s32.totalorder %s1000_s0, %s1000_s0 }
  0x3e   :  { %p1007_p2 = por %p1006_p1, %p1005_p0 }
  0x40   :  { %p1008_p3 = pnand %p1007_p2, %p1001_p13 }
  0x42   :  { %1011 = shalt.err (!%p1008_p3)
}
  0x43   :  { %48 = dma.hbm_to_vmem [thread:$0]  %s1304_s2, 384, %s43_s26, [#allocation5], %s1043_s10, %s1043_s10, %s1044_s12  }
  0x44   :  { %s1012_s19 = scalar_lea.hbm %s1310_s8, 256 }
  0x45   :  { %p1013_p4 = scmp.ne.s32.totalorder %s1310_s8, %s1012_s19  ;;  %p1016_p5 = scmp.lt.u32.totalorder %s1012_s19, %s1310_s8 }
  0x47   :  { %p1018_p6 = pnand %p1016_p5, %p1013_p4 }
  0x49   :  { %1021 = shalt.err (!%p1018_p6)
}
  0x4a   :  { %s1022_s22 = scalar_lea.vmem %s76_s28, 256  ;;  %p1027_p8 = scmp.lt.s32.totalorder %s76_s28, %s76_s28 }
  0x4b   :  { %p1023_p7 = scmp.ne.s32.totalorder %s76_s28, %s1022_s22  ;;  %p1028_p9 = scmp.lt.s32.totalorder %s1022_s22, %s1022_s22 }
  0x4d   :  { %p1029_p10 = por %p1028_p9, %p1027_p8 }
  0x4f   :  { %p1030_p11 = pnand %p1029_p10, %p1023_p7 }
  0x51   :  { %1033 = shalt.err (!%p1030_p11)
}
  0x52   :  { %78 = dma.hbm_to_vmem [thread:$0]  %s1310_s8, 256, %s76_s28, [#allocation8]  }
  0x53   :  { %1034 = dma.done.wait [#allocation3], 128  }
  0x54   :  { %1035 = vsyncadd [#allocation3], 4294967168 }
  0x55   :  { %1036 = dma.done.wait [#allocation5], 512  }
  0x56   :  { %1037 = vsyncadd [#allocation5], 4294966784 }
  0x57   :  { %1038 = dma.done.wait [#allocation8], 512  }
  0x58   :  { %1039 = vsyncadd [#allocation8], 4294966784  ;;  %v1047_v0 = vmov 0   ;;  %v882_v1 = vld [vmem:[#allocation6 + $0x4] ss:$8 sps:$4 sm:$0xff]   ;;  %vm118_vm0 = vcmask 1045504   ;;  %v233_v37 = vlaneseq }
  0x59   :  { %157 = vmatprep.mubr.bf16.mxu0 %v1047_v0  ;;  %224 = vmatprep.mubr.bf16.mxu1 %v1047_v0  ;;  %v884_v2 = vld [vmem:[#allocation7 + $0x4] ss:$8 sps:$4 sm:$0x3f]   ;;  %v886_v3 = vld [vmem:[#allocation6] ss:$8 sps:$4 sm:$0xff]   ;;  %vm185_vm1 = vcmask 1041408  }
  0x5a   :  { %192 = vmatprep.subr.bf16.mxu1 %v882_v1  ;;  %v887_v4 = vld [vmem:[#allocation7] ss:$8 sps:$4 sm:$0x3f]   ;;  %753 = vmatprep.subr.msk.bf16.mxu0 %vm118_vm0, %v884_v2  ;;  %v103_v6 = vld [vmem:[#allocation6 + $0x10] sm:$0x33]  ;;  %vm114_vm2 = vcmask 97280  }
  0x5b   :  { %v99_v5 = vld [vmem:[#allocation4] sm:$0xff]  ;;  %193 = vmatpush1.bf16.msra.mxu1 %v886_v3  ;;  %v120_v7 = vsel %vm118_vm0, %v887_v4, 0  ;;  %v758_v8 = vcombine.high %v103_v6, %v103_v6  ;;  %v757_v10 = vcombine.low %v103_v6, %v103_v6  ;;  %v97_v11 = vld [vmem:[#allocation2] sm:$0xff]  ;;  %vm181_vm3 = vcmask 162816   ;;  %v894_v18 = vld [vmem:[%s1306_s4 + $0x50] sm:$0xff]  }
  0x5c   :  { %v100_v9 = vpack.c.bf16 %v99_v5, %v99_v5  ;;  %126 = vmatpush1.bf16.msra.mxu0 %v120_v7  ;;  %v98_v13 = vpack.c.bf16 %v97_v11, %v97_v11  ;;  %v890_v14 = vld [vmem:[%s1306_s4 + $0x40] sm:$0xff]   ;;  %v892_v16 = vld [vmem:[%s1306_s4 + $0x48] sm:$0xff]   ;;  %v895_v19 = vld [vmem:[%s1306_s4 + $0x10] sm:$0xff]   ;;  %v1048_v31 = vmov 0.0   ;;  %v1240_v38 = vshrl.u32 %v233_v37, 7 }
  0x5d   :  { %759 = vmatprep.subr.msk.bf16.mxu1 %vm185_vm1, %v758_v8  ;;  %v187_v12 = vsel %vm185_vm1, %v757_v10, 0  ;;  %v891_v15 = vld [vmem:[%s1306_s4] sm:$0xff]   ;;  %793 = vmatprep.subr.bf16.mxu0 %v890_v14  ;;  %v893_v17 = vld [vmem:[%s1306_s4 + $0x8] sm:$0xff]   ;;  %v896_v20 = vld [vmem:[%s1306_s4 + $0x58] sm:$0xff]   ;;  %vm1049_vm4 = vmmov 0   ;;  %vm632_vm5 = vcmask 523264  }
  0x5e   :  { %v897_v21 = vld [vmem:[%s1306_s4 + $0x18] sm:$0xff]   ;;  %v898_v22 = vld [vmem:[%s1306_s4 + $0x60] sm:$0xff]   ;;  %v900_v24 = vld [vmem:[%s1306_s4 + $0x68] sm:$0xff]   ;;  %v235_v39 = vsub.s32 0, %v1240_v38  ;;  %vm698_vm6 = vcmask 261120   ;;  %vm742_vm7 = vcmask 7168  }
  0x5f   :  { %754 = vmatmul.mubr.msk.bf16.vlgmr.msra.gmra.mrb[0].mxu0 %vm114_vm2, %v100_v9  ;;  %195 = vmatpush1.bf16.msra.mxu1 %v187_v12  ;;  %v899_v23 = vld [vmem:[%s1306_s4 + $0x20] sm:$0xff]   ;;  %v901_v25 = vld [vmem:[%s1306_s4 + $0x28] sm:$0xff]   ;;  %v902_v26 = vld [vmem:[%s1306_s4 + $0x70] sm:$0xff]  }
  0x60   :  { %794 = vmatpush3.bf16.msra.mxu0 %v891_v15  ;;  %v903_v27 = vld [vmem:[%s1306_s4 + $0x30] sm:$0xff]   ;;  %v904_v28 = vld [vmem:[%s1306_s4 + $0x78] sm:$0xff]   ;;  %v906_v30 = vld [vmem:[%s1307_s5] sm:$0xff]   ;;  %832 = vmatprep.subr.bf16.mxu1 %v1048_v31 }
  0x61   :  { %795 = vmatprep.subr.bf16.mxu0 %v892_v16  ;;  %v905_v29 = vld [vmem:[%s1306_s4 + $0x38] sm:$0xff]   ;;  %v907_v32 = vld [vmem:[%s1307_s5 + $0x8] sm:$0xff]   ;;  %v908_v33 = vld [vmem:[%s1307_s5 + $0x10] sm:$0xff]  }
  0x62   :  { %760 = vmatmul.mubr.msk.bf16.vlgmr.msra.gmra.mrb[0].mxu1 %vm181_vm3, %v98_v13  ;;  %v909_v34 = vld [vmem:[%s1307_s5 + $0x18] sm:$0xff]   ;;  %v910_v35 = vld [vmem:[%s1307_s5 + $0x20] sm:$0xff]   ;;  %v911_v36 = vld [vmem:[%s1307_s5 + $0x28] sm:$0xff]  }
  0x63   :  { %833 = vmatpush3.bf16.msra.mxu1 %v906_v30  ;;  %v1243_v40 = vld [vmem:[#allocation9] sm:$0x7f]  ;;  %v1245_v42 = vld [vmem:[#allocation9 + $0x8] sm:$0x7f]  ;;  %848 = vmatprep.mubr.msk.bf16.mxu1 %vm1049_vm4, %v1048_v31 }
  0x64   :  { %796 = vmatpush3.bf16.msra.mxu0 %v893_v17  ;;  %834 = vmatprep.subr.bf16.mxu1 %v1048_v31  ;;  %v236_v45 = vrot.slane %v1243_v40, %v235_v39  ;;  %v240_v48 = vrot.slane %v1245_v42, %v235_v39 }
  0x65   :  { %797 = vmatprep.subr.bf16.mxu0 %v894_v18 }
  0x67   :  { %835 = vmatpush3.bf16.msra.mxu1 %v907_v32 }
  0x68   :  { %798 = vmatpush3.bf16.msra.mxu0 %v895_v19  ;;  %836 = vmatprep.subr.bf16.mxu1 %v1048_v31 }
  0x69   :  { %799 = vmatprep.subr.bf16.mxu0 %v896_v20 }
  0x6b   :  { %837 = vmatpush3.bf16.msra.mxu1 %v908_v33  ;;  %v292_v33 = vsub.s32 1, %v1240_v38 }
  0x6c   :  { %800 = vmatpush3.bf16.msra.mxu0 %v897_v21  ;;  %838 = vmatprep.subr.bf16.mxu1 %v1048_v31 }
  0x6d   :  { %801 = vmatprep.subr.bf16.mxu0 %v898_v22 }
  0x6f   :  { %839 = vmatpush3.bf16.msra.mxu1 %v909_v34  ;;  %v302_v34 = vsub.s32 2, %v1240_v38 }
  0x70   :  { %802 = vmatpush3.bf16.msra.mxu0 %v899_v23  ;;  %840 = vmatprep.subr.bf16.mxu1 %v1048_v31 }
  0x71   :  { %803 = vmatprep.subr.bf16.mxu0 %v900_v24 }
  0x73   :  { %841 = vmatpush3.bf16.msra.mxu1 %v910_v35 }
  0x74   :  { %804 = vmatpush3.bf16.msra.mxu0 %v901_v25  ;;  %842 = vmatprep.subr.bf16.mxu1 %v1048_v31 }
  0x75   :  { %805 = vmatprep.subr.bf16.mxu0 %v902_v26 }
  0x77   :  { %843 = vmatpush3.bf16.msra.mxu1 %v911_v36  ;;  %v293_v36 = vrot.slane %v1243_v40, %v292_v33 }
  0x78   :  { %806 = vmatpush3.bf16.msra.mxu0 %v903_v27  ;;  %844 = vmatprep.subr.bf16.mxu1 %v1048_v31 }
  0x79   :  { %807 = vmatprep.subr.bf16.mxu0 %v904_v28 }
  0x7c   :  { %808 = vmatpush3.bf16.msra.mxu0 %v905_v29 }
  0x7d   :  { %852 = vmatprep.subr.bf16.mxu0 %v1048_v31 }
 0x132   :  { %v159_v41 = vpop.f32.mrb[0].mxu0 }
 0x133   :  { %v161_v43 = vpop.f32.mrb[1].mxu0 }
 0x134   :  { %v163_v44 = vpop.f32.mrb[2].mxu0 }
 0x135   :  { %v164_v46 = vpop.f32.mrb[3].mxu0  ;;  %v226_v47 = vpop.f32.mrb[0].mxu1 }
 0x136   :  { %v227_v49 = vadd.f32 %v226_v47, %v159_v41  ;;  %v228_v50 = vpop.f32.mrb[1].mxu1  ;;  %v297_v41 = vrot.slane %v1245_v42, %v292_v33  ;;  %v307_v47 = vrot.slane %v1245_v42, %v302_v34  ;;  %v914_v42 = vld [vmem:[%s1308_s6] sm:$0xff]  }
 0x137   :  { %v229_v51 = vadd.f32 %v228_v50, %v161_v43  ;;  %v230_v52 = vpop.f32.mrb[2].mxu1 }
 0x138   :  { %v241_v53 = vadd.f32 %v236_v45, %v227_v49  ;;  %v231_v54 = vpop.f32.mrb[3].mxu1  ;;  %v303_v45 = vrot.slane %v1243_v40, %v302_v34 }
 0x139   :  { %v242_v55 = vadd.f32 %v240_v48, %v229_v51  ;;  %v912_v54 = vld [vmem:[%s1307_s5 + $0x30] sm:$0xff]  }
 0x13a   :  { %v243_v56 = vmax.f32 %v241_v53, 0.0  ;;  %845 = vmatpush3.bf16.msra.mxu1 %v912_v54 }
 0x13b   :  { %v244_v57 = vmax.f32 %v242_v55, 0.0  ;;  %846 = vmatprep.subr.bf16.mxu1 %v1048_v31  ;;  %v913_v55 = vld [vmem:[%s1307_s5 + $0x38] sm:$0xff]  }
 0x13c   :  { %v245_v58 = vrot.slane %v243_v56, 4  ;;  %v260_v59 = vmul.f32 %v243_v56, %v243_v56 }
 0x13d   :  { %v251_v60 = vrot.slane %v244_v57, 4  ;;  %v261_v61 = vmul.f32 %v244_v57, %v244_v57 }
 0x13e   :  { %v246_v62 = vadd.f32 %v245_v58, %v243_v56  ;;  %v262_v63 = vrot.slane %v260_v59, 4  ;;  %847 = vmatpush3.bf16.msra.mxu1 %v913_v55 }
 0x13f   :  { %v252_v0 = vadd.f32 %v251_v60, %v244_v57  ;;  %v268_v1 = vrot.slane %v261_v61, 4  ;;  %864 = vmatprep.subr.bf16.mxu1 %v1048_v31 }
 0x140   :  { %v247_v2 = vrot.slane %v246_v62, 2  ;;  %v263_v3 = vadd.f32 %v262_v63, %v260_v59 }
 0x141   :  { %v253_v4 = vrot.slane %v252_v0, 2  ;;  %v269_v5 = vadd.f32 %v268_v1, %v261_v61 }
 0x142   :  { %v248_v6 = vadd.f32 %v247_v2, %v246_v62  ;;  %v264_v7 = vrot.slane %v263_v3, 2 }
 0x143   :  { %v254_v8 = vadd.f32 %v253_v4, %v252_v0  ;;  %v270_v9 = vrot.slane %v269_v5, 2  ;;  %v917_v4 = vld [vmem:[%s1308_s6 + $0x18] sm:$0xff]  }
 0x144   :  { %v249_v10 = vrot.slane %v248_v6, 1  ;;  %v265_v11 = vadd.f32 %v264_v7, %v263_v3  ;;  %v916_v3 = vld [vmem:[%s1308_s6 + $0x10] sm:$0xff]  }
 0x145   :  { %v271_v12 = vadd.f32 %v270_v9, %v269_v5  ;;  %v255_v13 = vrot.slane %v254_v8, 1  ;;  %v918_v5 = vld [vmem:[%s1309_s7] sm:$0xff]  }
 0x146   :  { %v250_v14 = vadd.f32 %v249_v10, %v248_v6  ;;  %v266_v15 = vrot.slane %v265_v11, 1  ;;  %v504_v6 = vsub.s32 4, %v1240_v38 }
 0x147   :  { %v272_v16 = vrot.slane %v271_v12, 1  ;;  %v256_v17 = vadd.f32 %v255_v13, %v254_v8 }
 0x148   :  { %v258_v18 = vmul.f32 0.125, %v250_v14  ;;  %v267_v19 = vadd.f32 %v266_v15, %v265_v11  ;;  %v505_v7 = vrot.slane %v1243_v40, %v504_v6  ;;  %v919_v15 = vld [vmem:[%s1309_s7 + $0x8] sm:$0xff]  }
 0x149   :  { %v273_v20 = vadd.f32 %v272_v16, %v271_v12  ;;  %v259_v21 = vmul.f32 0.125, %v256_v17 }
 0x14a   :  { %v274_v22 = vmul.f32 0.125, %v267_v19  ;;  %v276_v23 = vmul.f32 %v258_v18, %v258_v18  ;;  %v282_v35 = vsub.f32 %v243_v56, %v258_v18  ;;  %v915_v56 = vld [vmem:[%s1308_s6 + $0x8] sm:$0xff]  }
 0x14b   :  { %v275_v24 = vmul.f32 0.125, %v273_v20  ;;  %v277_v25 = vmul.f32 %v259_v21, %v259_v21  ;;  %v283_v39 = vsub.f32 %v244_v57, %v259_v21  ;;  %v346_v57 = vsub.s32 3, %v1240_v38 }
 0x14c   :  { %v278_v26 = vsub.f32 %v274_v22, %v276_v23 }
 0x14d   :  { %v279_v27 = vsub.f32 %v275_v24, %v277_v25  ;;  %v347_v59 = vrot.slane %v1243_v40, %v346_v57  ;;  %v684_v24 = vsub.s32 6, %v1240_v38 }
 0x14e   :  { %v280_v28 = vmax.f32 %v278_v26, 0.0 }
 0x14f   :  { %v281_v29 = vmax.f32 %v279_v27, 0.0  ;;  %v685_v25 = vrot.slane %v1243_v40, %v684_v24 }
 0x150   :  { %v284_v30 = vadd.f32 1e-05, %v280_v28 }
 0x151   :  { %v285_v32 = vadd.f32 1e-05, %v281_v29 }
 0x152   :  { %920 = vrsqrt.f32 %v284_v30 }
 0x153   :  { %922 = vrsqrt.f32 %v285_v32 }
 0x15c   :  { %v921_v37 = vpop.eup %920 }
 0x15d   :  { %v923_v43 = vpop.eup %922  ;;  %v288_v44 = vmul.f32 %v921_v37, %v282_v35 }
 0x15e   :  { %v289_v46 = vmul.f32 %v923_v43, %v283_v39 }
 0x15f   :  { %v298_v48 = vmul.f32 %v293_v36, %v288_v44 }
 0x160   :  { %v299_v49 = vmul.f32 %v297_v41, %v289_v46 }
 0x161   :  { %v308_v50 = vadd.f32 %v303_v45, %v298_v48 }
 0x162   :  { %v309_v51 = vadd.f32 %v307_v47, %v299_v49 }
 0x163   :  { %v310_v53 = vpack.c.bf16 %v308_v50, %v308_v50 }
 0x164   :  { %v311_v52 = vpack.c.bf16 %v309_v51, %v309_v51 }
 0x166   :  { %476 = vmatprep.mubr.bf16.mxu0 %v311_v52 }
 0x167   :  { %477 = vmatmul.mubr.bf16.vlgmr.msra.gmra.mrb[4].mxu0 %v310_v53 }
 0x168   :  { %860 = vmatprep.mubr.msk.bf16.mxu0 %vm1049_vm4, %v1048_v31  ;;  %853 = vmatpush3.bf16.msra.mxu0 %v914_v42 }
 0x169   :  { %854 = vmatprep.subr.bf16.mxu0 %v1048_v31 }
 0x16c   :  { %855 = vmatpush3.bf16.msra.mxu0 %v915_v56 }
 0x16d   :  { %856 = vmatprep.subr.bf16.mxu0 %v1048_v31 }
 0x170   :  { %857 = vmatpush3.bf16.msra.mxu0 %v916_v3 }
 0x171   :  { %858 = vmatprep.subr.bf16.mxu0 %v1048_v31 }
 0x174   :  { %859 = vmatpush3.bf16.msra.mxu0 %v917_v4 }
 0x23a   :  { %v809_v58 = vpop.f32.mrb[4].mxu0 }
 0x23b   :  { %v810_v60 = vpop.f32.mrb[5].mxu0 }
 0x23c   :  { %v811_v61 = vadd.f32 %v810_v60, %v809_v58  ;;  %v812_v62 = vpop.f32.mrb[6].mxu0 }
 0x23d   :  { %v813_v63 = vpop.f32.mrb[7].mxu0 }
 0x23e   :  { %v479_v0 = vadd.f32 %v811_v61, %v347_v59 }
 0x240   :  { %v484_v1 = vmax.f32 %v479_v0, 0.0 }
 0x242   :  { %v485_v2 = vpack.c.bf16 %v484_v1, %v484_v1 }
 0x244   :  { %849 = vmatmul.mubr.bf16.vlgmr.msra.gmra.mrb[4].mxu1 %v485_v2 }
 0x245   :  { %868 = vmatprep.mubr.msk.bf16.mxu1 %vm1049_vm4, %v1048_v31  ;;  %865 = vmatpush3.bf16.msra.mxu1 %v918_v5 }
 0x246   :  { %866 = vmatprep.subr.bf16.mxu1 %v1048_v31  ;;  %v606_v31 = vsub.s32 5, %v1240_v38 }
 0x248   :  { %v607_v16 = vrot.slane %v1243_v40, %v606_v31 }
 0x249   :  { %867 = vmatpush3.bf16.msra.mxu1 %v919_v15 }
 0x317   :  { %v588_v8 = vpop.f32.mrb[4].mxu1 }
 0x318   :  { %v589_v9 = vadd.f32 %v588_v8, %v505_v7  ;;  %v850_v10 = vpop.f32.mrb[5].mxu1 }
 0x319   :  { %v591_v11 = vpop.f32.mrb[6].mxu1 }
 0x31a   :  { %v594_v12 = vmax.f32 %v589_v9, 0.0  ;;  %v851_v13 = vpop.f32.mrb[7].mxu1 }
 0x31c   :  { %v595_v14 = vpack.c.bf16 %v594_v12, %v594_v12 }
 0x31e   :  { %861 = vmatmul.mubr.msk.bf16.vlgmr.msra.gmra.mrb[8].mxu0 %vm632_vm5, %v595_v14 }
 0x3f1   :  { %v670_v17 = vpop.f32.mrb[8].mxu0 }
 0x3f2   :  { %v671_v18 = vadd.f32 %v670_v17, %v607_v16  ;;  %v862_v19 = vpop.f32.mrb[9].mxu0 }
 0x3f3   :  { %v673_v20 = vpop.f32.mrb[10].mxu0 }
 0x3f4   :  { %v676_v21 = vmax.f32 %v671_v18, 0.0  ;;  %v863_v22 = vpop.f32.mrb[11].mxu0 }
 0x3f6   :  { %v677_v23 = vpack.c.bf16 %v676_v21, %v676_v21 }
 0x3f8   :  { %869 = vmatmul.mubr.msk.bf16.vlgmr.msra.gmra.mrb[8].mxu1 %vm698_vm6, %v677_v23 }
 0x4cb   :  { %v736_v26 = vpop.f32.mrb[8].mxu1 }
 0x4cc   :  { %v737_v27 = vadd.f32 %v736_v26, %v685_v25  ;;  %v870_v28 = vpop.f32.mrb[9].mxu1 }
 0x4cd   :  { %v739_v29 = vpop.f32.mrb[10].mxu1 }
 0x4ce   :  { %743 = vst.msk [vmem:[%s1311_s9] sm:$0xff] %vm742_vm7, %v737_v27  ;;  %v871_v30 = vpop.f32.mrb[11].mxu1 }
 0x4cf   :  { %748 = vsyncpa [#allocation3], 1 }
 0x4d0   :  { %749 = vsyncpa [#allocation5], 1 }
 0x4d1   :  { %750 = vsyncpa [#allocation8], 1 }

</bundles_post_ra>
